<compile_context>
chip_gen: v6e
topology: v6e:2x2x1
jax: 0.10.0
libtpu: 0.0.40
codegen_flags: <defaults>
</compile_context>

<pallas_src>
import jax
import jax.numpy as jnp
from jax.experimental import pallas as pl
from jax.experimental.pallas import tpu as pltpu


def _round_up(x, m):
    return (x + m - 1) // m * m


# ----------------------------------------------------------------------------
# Fused kernel: one (batch, channel-tile) block per grid step.
# ----------------------------------------------------------------------------
def _fused_forecaster_kernel(x_ref, w_enc_ref, b_enc_ref, w_head_ref,
                             b_head_ref, o_ref):
    """
    x_ref:      (num_patch, TC, patch_len)   input patches (transpose absorbed)
    w_enc_ref:  (patch_len, d_model)         encoder projection weight (resident)
    b_enc_ref:  (1, d_model)                 encoder bias (f32)
    w_head_ref: (num_patch, d_model, N_pad)  head weight split per patch (resident)
    b_head_ref: (1, N_pad)                   head bias (f32, zero-padded)
    o_ref:      (TC, N_pad)                  lane-dense output block
    """
    num_patch, tc, _ = x_ref.shape
    n_pad = o_ref.shape[-1]

    acc = jnp.zeros((tc, n_pad), dtype=jnp.float32)
    # Static unroll over patches (num_patch is small); per-patch head GEMM is
    # mathematically the flatten+Linear of PredictionHead.
    for p in range(num_patch):
        enc_p = jnp.dot(x_ref[p], w_enc_ref[...],
                        preferred_element_type=jnp.float32) + b_enc_ref[...]
        acc = acc + jnp.dot(enc_p.astype(w_head_ref.dtype), w_head_ref[p],
                            preferred_element_type=jnp.float32)
    o_ref[...] = (acc + b_head_ref[...]).astype(o_ref.dtype)


# ----------------------------------------------------------------------------
# Wrapper: parameter prep + BlockSpecs / grid + pad removal.
# ----------------------------------------------------------------------------
def forecaster_forward(X, params, *, compute_dtype=jnp.float32,
                       channel_tile=None):
    """X: (bs, num_patch, ch, patch_len) -> (bs, forecast_len, ch)."""
    bs, num_patch, ch, patch_len = X.shape
    d_model = params["w_enc"].shape[1]
    head_dim, forecast_len = params["w_head"].shape
    assert head_dim == num_patch * d_model

    n_pad = _round_up(forecast_len, 128)          # lane-dense output stores
    itemsize = jnp.dtype(compute_dtype).itemsize

    # ---- parameter prep (tiny, runs once under jit) --------------------------
    x = X.astype(compute_dtype)
    w_enc = params["w_enc"].astype(compute_dtype)
    b_enc = params["b_enc"].reshape(1, d_model).astype(jnp.float32)
    # (num_patch*d_model, F) -> (num_patch, d_model, F), zero-pad lanes to n_pad
    w_head = params["w_head"].reshape(num_patch, d_model, forecast_len)
    w_head = jnp.pad(w_head, ((0, 0), (0, 0), (0, n_pad - forecast_len)))
    w_head = w_head.astype(compute_dtype)
    b_head = jnp.pad(params["b_head"], (0, n_pad - forecast_len))
    b_head = b_head.reshape(1, n_pad).astype(jnp.float32)

    # ---- channel tile: full axis unless ch is huge (then a multiple of 8) ----
    if channel_tile is not None:
        tc = channel_tile
    elif ch % 8 != 0 or ch <= 512:
        tc = ch
    else:
        tc = 512
        while ch % tc:
            tc -= 8
    assert ch % tc == 0 and (tc == ch or tc % 8 == 0)

    grid = (bs, ch // tc)

    flops = (2 * bs * ch * num_patch * patch_len * d_model
             + 2 * bs * ch * num_patch * d_model * n_pad)
    bytes_accessed = (bs * ch * num_patch * patch_len * itemsize      # X
                      + patch_len * d_model * itemsize                # w_enc
                      + num_patch * d_model * n_pad * itemsize        # w_head
                      + (d_model + n_pad) * 4                         # biases
                      + bs * ch * n_pad * jnp.dtype(X.dtype).itemsize)  # out

    out = pl.pallas_call(
        _fused_forecaster_kernel,
        out_shape=jax.ShapeDtypeStruct((bs, ch, n_pad), X.dtype),
        grid=grid,
        in_specs=[
            # transpose(1, 2) absorbed here: block walks (b, :, c-tile, :)
            pl.BlockSpec((None, num_patch, tc, patch_len),
                         lambda b, c: (b, 0, c, 0)),
            pl.BlockSpec((patch_len, d_model), lambda b, c: (0, 0)),
            pl.BlockSpec((1, d_model), lambda b, c: (0, 0)),
            pl.BlockSpec((num_patch, d_model, n_pad), lambda b, c: (0, 0, 0)),
            pl.BlockSpec((1, n_pad), lambda b, c: (0, 0)),
        ],
        out_specs=pl.BlockSpec((None, tc, n_pad), lambda b, c: (b, c, 0)),
        compiler_params=pltpu.CompilerParams(
            dimension_semantics=("parallel", "parallel")),
        cost_estimate=pl.CostEstimate(flops=flops, transcendentals=0,
                                      bytes_accessed=bytes_accessed),
    )(x, w_enc, b_enc, w_head, b_head)

    y = out[:, :, :forecast_len].astype(X.dtype)   # drop lane padding
    return jnp.transpose(y, (0, 2, 1))             # (bs, forecast_len, ch)


# ----------------------------------------------------------------------------
# Pure-JAX reference (correctness check)
# ----------------------------------------------------------------------------
def forecaster_forward_ref(X, params):
    bs, num_patch, ch, patch_len = X.shape
    d_model = params["w_enc"].shape[1]
    Xt = jnp.transpose(X, (0, 2, 1, 3)).reshape(bs * ch, num_patch, patch_len)
    enc = Xt @ params["w_enc"] + params["b_enc"]
    flat = enc.reshape(bs, ch, num_patch * d_model)
    y = flat @ params["w_head"] + params["b_head"]
    return jnp.transpose(y, (0, 2, 1))


if __name__ == "__main__":
    bs, num_patch, ch, patch_len = 2, 8, 4, 16
    d_model, forecast_len = 32, 24
    head_dim = d_model * num_patch

    key = jax.random.PRNGKey(0)
    k_x, k_we, k_be, k_wh, k_bh = jax.random.split(key, 5)

    X = jax.random.normal(k_x, (bs, num_patch, ch, patch_len), jnp.float32)
    params = {
        "w_enc": jax.random.normal(k_we, (patch_len, d_model), jnp.float32) * 0.05,
        "b_enc": jax.random.normal(k_be, (d_model,), jnp.float32) * 0.01,
        "w_head": jax.random.normal(k_wh, (head_dim, forecast_len), jnp.float32) * 0.05,
        "b_head": jax.random.normal(k_bh, (forecast_len,), jnp.float32) * 0.01,
    }

    fwd = jax.jit(forecaster_forward)
    y = jax.block_until_ready(fwd(X, params))
    y_ref = forecaster_forward_ref(X, params)

    assert y.shape == (bs, forecast_len, ch), y.shape
    # f32 compute; tolerance covers accumulation-order differences only.
    assert jnp.allclose(y, y_ref, atol=1e-3, rtol=1e-3), float(
        jnp.max(jnp.abs(y - y_ref)))

    print("KERNEL_OK")
</pallas_src>

<mosaic_0001>
module attributes {stable_mosaic.version = 11 : i64} {
  func.func @_fused_forecaster_kernel(%arg0: i32, %arg1: i32, %arg2: memref<1x8x4x16xf32, #tpu.memory_space<vmem>>, %arg3: memref<16x32xf32, #tpu.memory_space<vmem>>, %arg4: memref<1x32xf32, #tpu.memory_space<vmem>>, %arg5: memref<8x32x128xf32, #tpu.memory_space<vmem>>, %arg6: memref<1x128xf32, #tpu.memory_space<vmem>>, %arg7: memref<1x4x128xf32, #tpu.memory_space<vmem>>) attributes {dimension_semantics = [#tpu.dimension_semantics<parallel>, #tpu.dimension_semantics<parallel>], iteration_bounds = array<i64: 2, 1>, scalar_prefetch = 0 : i64, scratch_operands = 0 : i64, tpu.core_type = #tpu.core_type<tc>, window_params = [{transform_indices = @transform_0, window_bounds = array<i64: 1, 8, 4, 16>}, {pipeline_mode = #tpu.pipeline_mode<synchronous>, transform_indices = @transform_1, window_bounds = array<i64: 16, 32>}, {pipeline_mode = #tpu.pipeline_mode<synchronous>, transform_indices = @transform_2, window_bounds = array<i64: 1, 32>}, {pipeline_mode = #tpu.pipeline_mode<synchronous>, transform_indices = @transform_3, window_bounds = array<i64: 8, 32, 128>}, {pipeline_mode = #tpu.pipeline_mode<synchronous>, transform_indices = @transform_4, window_bounds = array<i64: 1, 128>}, {transform_indices = @transform_5, window_bounds = array<i64: 1, 4, 128>}]} {
    %cst = arith.constant 0.000000e+00 : f32
    %0 = vector.broadcast %cst : f32 to vector<4x128xf32>
    %c0 = arith.constant 0 : index
    %c0_0 = arith.constant 0 : index
    %c0_1 = arith.constant 0 : index
    %c0_2 = arith.constant 0 : index
    %1 = vector.load %arg2[%c0, %c0_0, %c0_1, %c0_2] : memref<1x8x4x16xf32, #tpu.memory_space<vmem>>, vector<1x1x4x16xf32>
    %2 = vector.shape_cast %1 : vector<1x1x4x16xf32> to vector<4x16xf32>
    %c0_3 = arith.constant 0 : index
    %c0_4 = arith.constant 0 : index
    %3 = vector.load %arg3[%c0_3, %c0_4] : memref<16x32xf32, #tpu.memory_space<vmem>>, vector<16x32xf32>
    %cst_5 = arith.constant dense<0.000000e+00> : vector<4x32xf32>
    %4 = tpu.matmul %2, %3, %cst_5 {dimension_numbers = #tpu.dot_dimension_numbers<[1], [0], [0], [1], [0, 0, 1, 1], [], []>} : vector<4x16xf32>, vector<16x32xf32>, vector<4x32xf32> -> vector<4x32xf32>
    %c0_6 = arith.constant 0 : index
    %c0_7 = arith.constant 0 : index
    %5 = vector.load %arg4[%c0_6, %c0_7] : memref<1x32xf32, #tpu.memory_space<vmem>>, vector<1x32xf32>
    %6 = vector.broadcast %5 : vector<1x32xf32> to vector<4x32xf32>
    %7 = arith.addf %4, %6 : vector<4x32xf32>
    %c0_8 = arith.constant 0 : index
    %c0_9 = arith.constant 0 : index
    %c0_10 = arith.constant 0 : index
    %8 = vector.load %arg5[%c0_8, %c0_9, %c0_10] : memref<8x32x128xf32, #tpu.memory_space<vmem>>, vector<1x32x128xf32>
    %9 = vector.shape_cast %8 : vector<1x32x128xf32> to vector<32x128xf32>
    %cst_11 = arith.constant dense<0.000000e+00> : vector<4x128xf32>
    %10 = tpu.matmul %7, %9, %cst_11 {dimension_numbers = #tpu.dot_dimension_numbers<[1], [0], [0], [1], [0, 0, 1, 1], [], []>} : vector<4x32xf32>, vector<32x128xf32>, vector<4x128xf32> -> vector<4x128xf32>
    %11 = arith.addf %0, %10 : vector<4x128xf32>
    %c0_12 = arith.constant 0 : index
    %c1 = arith.constant 1 : index
    %c0_13 = arith.constant 0 : index
    %c0_14 = arith.constant 0 : index
    %12 = vector.load %arg2[%c0_12, %c1, %c0_13, %c0_14] : memref<1x8x4x16xf32, #tpu.memory_space<vmem>>, vector<1x1x4x16xf32>
    %13 = vector.shape_cast %12 : vector<1x1x4x16xf32> to vector<4x16xf32>
    %c0_15 = arith.constant 0 : index
    %c0_16 = arith.constant 0 : index
    %14 = vector.load %arg3[%c0_15, %c0_16] : memref<16x32xf32, #tpu.memory_space<vmem>>, vector<16x32xf32>
    %cst_17 = arith.constant dense<0.000000e+00> : vector<4x32xf32>
    %15 = tpu.matmul %13, %14, %cst_17 {dimension_numbers = #tpu.dot_dimension_numbers<[1], [0], [0], [1], [0, 0, 1, 1], [], []>} : vector<4x16xf32>, vector<16x32xf32>, vector<4x32xf32> -> vector<4x32xf32>
    %c0_18 = arith.constant 0 : index
    %c0_19 = arith.constant 0 : index
    %16 = vector.load %arg4[%c0_18, %c0_19] : memref<1x32xf32, #tpu.memory_space<vmem>>, vector<1x32xf32>
    %17 = vector.broadcast %16 : vector<1x32xf32> to vector<4x32xf32>
    %18 = arith.addf %15, %17 : vector<4x32xf32>
    %c1_20 = arith.constant 1 : index
    %c0_21 = arith.constant 0 : index
    %c0_22 = arith.constant 0 : index
    %19 = vector.load %arg5[%c1_20, %c0_21, %c0_22] : memref<8x32x128xf32, #tpu.memory_space<vmem>>, vector<1x32x128xf32>
    %20 = vector.shape_cast %19 : vector<1x32x128xf32> to vector<32x128xf32>
    %cst_23 = arith.constant dense<0.000000e+00> : vector<4x128xf32>
    %21 = tpu.matmul %18, %20, %cst_23 {dimension_numbers = #tpu.dot_dimension_numbers<[1], [0], [0], [1], [0, 0, 1, 1], [], []>} : vector<4x32xf32>, vector<32x128xf32>, vector<4x128xf32> -> vector<4x128xf32>
    %22 = arith.addf %11, %21 : vector<4x128xf32>
    %c0_24 = arith.constant 0 : index
    %c2 = arith.constant 2 : index
    %c0_25 = arith.constant 0 : index
    %c0_26 = arith.constant 0 : index
    %23 = vector.load %arg2[%c0_24, %c2, %c0_25, %c0_26] : memref<1x8x4x16xf32, #tpu.memory_space<vmem>>, vector<1x1x4x16xf32>
    %24 = vector.shape_cast %23 : vector<1x1x4x16xf32> to vector<4x16xf32>
    %c0_27 = arith.constant 0 : index
    %c0_28 = arith.constant 0 : index
    %25 = vector.load %arg3[%c0_27, %c0_28] : memref<16x32xf32, #tpu.memory_space<vmem>>, vector<16x32xf32>
    %cst_29 = arith.constant dense<0.000000e+00> : vector<4x32xf32>
    %26 = tpu.matmul %24, %25, %cst_29 {dimension_numbers = #tpu.dot_dimension_numbers<[1], [0], [0], [1], [0, 0, 1, 1], [], []>} : vector<4x16xf32>, vector<16x32xf32>, vector<4x32xf32> -> vector<4x32xf32>
    %c0_30 = arith.constant 0 : index
    %c0_31 = arith.constant 0 : index
    %27 = vector.load %arg4[%c0_30, %c0_31] : memref<1x32xf32, #tpu.memory_space<vmem>>, vector<1x32xf32>
    %28 = vector.broadcast %27 : vector<1x32xf32> to vector<4x32xf32>
    %29 = arith.addf %26, %28 : vector<4x32xf32>
    %c2_32 = arith.constant 2 : index
    %c0_33 = arith.constant 0 : index
    %c0_34 = arith.constant 0 : index
    %30 = vector.load %arg5[%c2_32, %c0_33, %c0_34] : memref<8x32x128xf32, #tpu.memory_space<vmem>>, vector<1x32x128xf32>
    %31 = vector.shape_cast %30 : vector<1x32x128xf32> to vector<32x128xf32>
    %cst_35 = arith.constant dense<0.000000e+00> : vector<4x128xf32>
    %32 = tpu.matmul %29, %31, %cst_35 {dimension_numbers = #tpu.dot_dimension_numbers<[1], [0], [0], [1], [0, 0, 1, 1], [], []>} : vector<4x32xf32>, vector<32x128xf32>, vector<4x128xf32> -> vector<4x128xf32>
    %33 = arith.addf %22, %32 : vector<4x128xf32>
    %c0_36 = arith.constant 0 : index
    %c3 = arith.constant 3 : index
    %c0_37 = arith.constant 0 : index
    %c0_38 = arith.constant 0 : index
    %34 = vector.load %arg2[%c0_36, %c3, %c0_37, %c0_38] : memref<1x8x4x16xf32, #tpu.memory_space<vmem>>, vector<1x1x4x16xf32>
    %35 = vector.shape_cast %34 : vector<1x1x4x16xf32> to vector<4x16xf32>
    %c0_39 = arith.constant 0 : index
    %c0_40 = arith.constant 0 : index
    %36 = vector.load %arg3[%c0_39, %c0_40] : memref<16x32xf32, #tpu.memory_space<vmem>>, vector<16x32xf32>
    %cst_41 = arith.constant dense<0.000000e+00> : vector<4x32xf32>
    %37 = tpu.matmul %35, %36, %cst_41 {dimension_numbers = #tpu.dot_dimension_numbers<[1], [0], [0], [1], [0, 0, 1, 1], [], []>} : vector<4x16xf32>, vector<16x32xf32>, vector<4x32xf32> -> vector<4x32xf32>
    %c0_42 = arith.constant 0 : index
    %c0_43 = arith.constant 0 : index
    %38 = vector.load %arg4[%c0_42, %c0_43] : memref<1x32xf32, #tpu.memory_space<vmem>>, vector<1x32xf32>
    %39 = vector.broadcast %38 : vector<1x32xf32> to vector<4x32xf32>
    %40 = arith.addf %37, %39 : vector<4x32xf32>
    %c3_44 = arith.constant 3 : index
    %c0_45 = arith.constant 0 : index
    %c0_46 = arith.constant 0 : index
    %41 = vector.load %arg5[%c3_44, %c0_45, %c0_46] : memref<8x32x128xf32, #tpu.memory_space<vmem>>, vector<1x32x128xf32>
    %42 = vector.shape_cast %41 : vector<1x32x128xf32> to vector<32x128xf32>
    %cst_47 = arith.constant dense<0.000000e+00> : vector<4x128xf32>
    %43 = tpu.matmul %40, %42, %cst_47 {dimension_numbers = #tpu.dot_dimension_numbers<[1], [0], [0], [1], [0, 0, 1, 1], [], []>} : vector<4x32xf32>, vector<32x128xf32>, vector<4x128xf32> -> vector<4x128xf32>
    %44 = arith.addf %33, %43 : vector<4x128xf32>
    %c0_48 = arith.constant 0 : index
    %c4 = arith.constant 4 : index
    %c0_49 = arith.constant 0 : index
    %c0_50 = arith.constant 0 : index
    %45 = vector.load %arg2[%c0_48, %c4, %c0_49, %c0_50] : memref<1x8x4x16xf32, #tpu.memory_space<vmem>>, vector<1x1x4x16xf32>
    %46 = vector.shape_cast %45 : vector<1x1x4x16xf32> to vector<4x16xf32>
    %c0_51 = arith.constant 0 : index
    %c0_52 = arith.constant 0 : index
    %47 = vector.load %arg3[%c0_51, %c0_52] : memref<16x32xf32, #tpu.memory_space<vmem>>, vector<16x32xf32>
    %cst_53 = arith.constant dense<0.000000e+00> : vector<4x32xf32>
    %48 = tpu.matmul %46, %47, %cst_53 {dimension_numbers = #tpu.dot_dimension_numbers<[1], [0], [0], [1], [0, 0, 1, 1], [], []>} : vector<4x16xf32>, vector<16x32xf32>, vector<4x32xf32> -> vector<4x32xf32>
    %c0_54 = arith.constant 0 : index
    %c0_55 = arith.constant 0 : index
    %49 = vector.load %arg4[%c0_54, %c0_55] : memref<1x32xf32, #tpu.memory_space<vmem>>, vector<1x32xf32>
    %50 = vector.broadcast %49 : vector<1x32xf32> to vector<4x32xf32>
    %51 = arith.addf %48, %50 : vector<4x32xf32>
    %c4_56 = arith.constant 4 : index
    %c0_57 = arith.constant 0 : index
    %c0_58 = arith.constant 0 : index
    %52 = vector.load %arg5[%c4_56, %c0_57, %c0_58] : memref<8x32x128xf32, #tpu.memory_space<vmem>>, vector<1x32x128xf32>
    %53 = vector.shape_cast %52 : vector<1x32x128xf32> to vector<32x128xf32>
    %cst_59 = arith.constant dense<0.000000e+00> : vector<4x128xf32>
    %54 = tpu.matmul %51, %53, %cst_59 {dimension_numbers = #tpu.dot_dimension_numbers<[1], [0], [0], [1], [0, 0, 1, 1], [], []>} : vector<4x32xf32>, vector<32x128xf32>, vector<4x128xf32> -> vector<4x128xf32>
    %55 = arith.addf %44, %54 : vector<4x128xf32>
    %c0_60 = arith.constant 0 : index
    %c5 = arith.constant 5 : index
    %c0_61 = arith.constant 0 : index
    %c0_62 = arith.constant 0 : index
    %56 = vector.load %arg2[%c0_60, %c5, %c0_61, %c0_62] : memref<1x8x4x16xf32, #tpu.memory_space<vmem>>, vector<1x1x4x16xf32>
    %57 = vector.shape_cast %56 : vector<1x1x4x16xf32> to vector<4x16xf32>
    %c0_63 = arith.constant 0 : index
    %c0_64 = arith.constant 0 : index
    %58 = vector.load %arg3[%c0_63, %c0_64] : memref<16x32xf32, #tpu.memory_space<vmem>>, vector<16x32xf32>
    %cst_65 = arith.constant dense<0.000000e+00> : vector<4x32xf32>
    %59 = tpu.matmul %57, %58, %cst_65 {dimension_numbers = #tpu.dot_dimension_numbers<[1], [0], [0], [1], [0, 0, 1, 1], [], []>} : vector<4x16xf32>, vector<16x32xf32>, vector<4x32xf32> -> vector<4x32xf32>
    %c0_66 = arith.constant 0 : index
    %c0_67 = arith.constant 0 : index
    %60 = vector.load %arg4[%c0_66, %c0_67] : memref<1x32xf32, #tpu.memory_space<vmem>>, vector<1x32xf32>
    %61 = vector.broadcast %60 : vector<1x32xf32> to vector<4x32xf32>
    %62 = arith.addf %59, %61 : vector<4x32xf32>
    %c5_68 = arith.constant 5 : index
    %c0_69 = arith.constant 0 : index
    %c0_70 = arith.constant 0 : index
    %63 = vector.load %arg5[%c5_68, %c0_69, %c0_70] : memref<8x32x128xf32, #tpu.memory_space<vmem>>, vector<1x32x128xf32>
    %64 = vector.shape_cast %63 : vector<1x32x128xf32> to vector<32x128xf32>
    %cst_71 = arith.constant dense<0.000000e+00> : vector<4x128xf32>
    %65 = tpu.matmul %62, %64, %cst_71 {dimension_numbers = #tpu.dot_dimension_numbers<[1], [0], [0], [1], [0, 0, 1, 1], [], []>} : vector<4x32xf32>, vector<32x128xf32>, vector<4x128xf32> -> vector<4x128xf32>
    %66 = arith.addf %55, %65 : vector<4x128xf32>
    %c0_72 = arith.constant 0 : index
    %c6 = arith.constant 6 : index
    %c0_73 = arith.constant 0 : index
    %c0_74 = arith.constant 0 : index
    %67 = vector.load %arg2[%c0_72, %c6, %c0_73, %c0_74] : memref<1x8x4x16xf32, #tpu.memory_space<vmem>>, vector<1x1x4x16xf32>
    %68 = vector.shape_cast %67 : vector<1x1x4x16xf32> to vector<4x16xf32>
    %c0_75 = arith.constant 0 : index
    %c0_76 = arith.constant 0 : index
    %69 = vector.load %arg3[%c0_75, %c0_76] : memref<16x32xf32, #tpu.memory_space<vmem>>, vector<16x32xf32>
    %cst_77 = arith.constant dense<0.000000e+00> : vector<4x32xf32>
    %70 = tpu.matmul %68, %69, %cst_77 {dimension_numbers = #tpu.dot_dimension_numbers<[1], [0], [0], [1], [0, 0, 1, 1], [], []>} : vector<4x16xf32>, vector<16x32xf32>, vector<4x32xf32> -> vector<4x32xf32>
    %c0_78 = arith.constant 0 : index
    %c0_79 = arith.constant 0 : index
    %71 = vector.load %arg4[%c0_78, %c0_79] : memref<1x32xf32, #tpu.memory_space<vmem>>, vector<1x32xf32>
    %72 = vector.broadcast %71 : vector<1x32xf32> to vector<4x32xf32>
    %73 = arith.addf %70, %72 : vector<4x32xf32>
    %c6_80 = arith.constant 6 : index
    %c0_81 = arith.constant 0 : index
    %c0_82 = arith.constant 0 : index
    %74 = vector.load %arg5[%c6_80, %c0_81, %c0_82] : memref<8x32x128xf32, #tpu.memory_space<vmem>>, vector<1x32x128xf32>
    %75 = vector.shape_cast %74 : vector<1x32x128xf32> to vector<32x128xf32>
    %cst_83 = arith.constant dense<0.000000e+00> : vector<4x128xf32>
    %76 = tpu.matmul %73, %75, %cst_83 {dimension_numbers = #tpu.dot_dimension_numbers<[1], [0], [0], [1], [0, 0, 1, 1], [], []>} : vector<4x32xf32>, vector<32x128xf32>, vector<4x128xf32> -> vector<4x128xf32>
    %77 = arith.addf %66, %76 : vector<4x128xf32>
    %c0_84 = arith.constant 0 : index
    %c7 = arith.constant 7 : index
    %c0_85 = arith.constant 0 : index
    %c0_86 = arith.constant 0 : index
    %78 = vector.load %arg2[%c0_84, %c7, %c0_85, %c0_86] : memref<1x8x4x16xf32, #tpu.memory_space<vmem>>, vector<1x1x4x16xf32>
    %79 = vector.shape_cast %78 : vector<1x1x4x16xf32> to vector<4x16xf32>
    %c0_87 = arith.constant 0 : index
    %c0_88 = arith.constant 0 : index
    %80 = vector.load %arg3[%c0_87, %c0_88] : memref<16x32xf32, #tpu.memory_space<vmem>>, vector<16x32xf32>
    %cst_89 = arith.constant dense<0.000000e+00> : vector<4x32xf32>
    %81 = tpu.matmul %79, %80, %cst_89 {dimension_numbers = #tpu.dot_dimension_numbers<[1], [0], [0], [1], [0, 0, 1, 1], [], []>} : vector<4x16xf32>, vector<16x32xf32>, vector<4x32xf32> -> vector<4x32xf32>
    %c0_90 = arith.constant 0 : index
    %c0_91 = arith.constant 0 : index
    %82 = vector.load %arg4[%c0_90, %c0_91] : memref<1x32xf32, #tpu.memory_space<vmem>>, vector<1x32xf32>
    %83 = vector.broadcast %82 : vector<1x32xf32> to vector<4x32xf32>
    %84 = arith.addf %81, %83 : vector<4x32xf32>
    %c7_92 = arith.constant 7 : index
    %c0_93 = arith.constant 0 : index
    %c0_94 = arith.constant 0 : index
    %85 = vector.load %arg5[%c7_92, %c0_93, %c0_94] : memref<8x32x128xf32, #tpu.memory_space<vmem>>, vector<1x32x128xf32>
    %86 = vector.shape_cast %85 : vector<1x32x128xf32> to vector<32x128xf32>
    %cst_95 = arith.constant dense<0.000000e+00> : vector<4x128xf32>
    %87 = tpu.matmul %84, %86, %cst_95 {dimension_numbers = #tpu.dot_dimension_numbers<[1], [0], [0], [1], [0, 0, 1, 1], [], []>} : vector<4x32xf32>, vector<32x128xf32>, vector<4x128xf32> -> vector<4x128xf32>
    %88 = arith.addf %77, %87 : vector<4x128xf32>
    %c0_96 = arith.constant 0 : index
    %c0_97 = arith.constant 0 : index
    %89 = vector.load %arg6[%c0_96, %c0_97] : memref<1x128xf32, #tpu.memory_space<vmem>>, vector<1x128xf32>
    %90 = vector.broadcast %89 : vector<1x128xf32> to vector<4x128xf32>
    %91 = arith.addf %88, %90 : vector<4x128xf32>
    %c0_98 = arith.constant 0 : index
    %c0_99 = arith.constant 0 : index
    %c0_100 = arith.constant 0 : index
    %92 = vector.load %arg7[%c0_98, %c0_99, %c0_100] : memref<1x4x128xf32, #tpu.memory_space<vmem>>, vector<1x4x128xf32>
    %93 = vector.shape_cast %92 : vector<1x4x128xf32> to vector<4x128xf32>
    %94 = vector.shape_cast %91 : vector<4x128xf32> to vector<1x4x128xf32>
    tpu.vector_store %arg7[%c0_98, %c0_99, %c0_100], %94 {strides = array<i32>} : memref<1x4x128xf32, #tpu.memory_space<vmem>>, vector<1x4x128xf32>,
    return
  }
  func.func @transform_0(%arg0: i32, %arg1: i32) -> (i32, i32, i32, i32) {
    %c0_i32 = arith.constant 0 : i32
    %c0_i32_0 = arith.constant 0 : i32
    %c0_i32_1 = arith.constant 0 : i32
    return %arg0, %c0_i32, %arg1, %c0_i32_0 : i32, i32, i32, i32
  }
  func.func @transform_1(%arg0: i32, %arg1: i32) -> (i32, i32) {
    %c0_i32 = arith.constant 0 : i32
    %c0_i32_0 = arith.constant 0 : i32
    %c0_i32_1 = arith.constant 0 : i32
    return %c0_i32, %c0_i32_0 : i32, i32
  }
  func.func @transform_2(%arg0: i32, %arg1: i32) -> (i32, i32) {
    %c0_i32 = arith.constant 0 : i32
    %c0_i32_0 = arith.constant 0 : i32
    %c0_i32_1 = arith.constant 0 : i32
    return %c0_i32, %c0_i32_0 : i32, i32
  }
  func.func @transform_3(%arg0: i32, %arg1: i32) -> (i32, i32, i32) {
    %c0_i32 = arith.constant 0 : i32
    %c0_i32_0 = arith.constant 0 : i32
    %c0_i32_1 = arith.constant 0 : i32
    %c0_i32_2 = arith.constant 0 : i32
    return %c0_i32, %c0_i32_0, %c0_i32_1 : i32, i32, i32
  }
  func.func @transform_4(%arg0: i32, %arg1: i32) -> (i32, i32) {
    %c0_i32 = arith.constant 0 : i32
    %c0_i32_0 = arith.constant 0 : i32
    %c0_i32_1 = arith.constant 0 : i32
    return %c0_i32, %c0_i32_0 : i32, i32
  }
  func.func @transform_5(%arg0: i32, %arg1: i32) -> (i32, i32, i32) {
    %c0_i32 = arith.constant 0 : i32
    %c0_i32_0 = arith.constant 0 : i32
    return %arg0, %arg1, %c0_i32 : i32, i32, i32
  }
}

</mosaic_0001>

<bundles_post_ra>
// kernel: forecaster_forward.1
= control target key start
LH: loop header
LB: loop body
LE: loop exit
PB: predicated region body
PF: predicated region fallthrough
CT: control target
= control target key end

     0   :  { %s1933_s18 = smov 0   ;;  %s1935_s19 = smov 0   ;;  %s2214_s0 = inlined_call_operand.vmem [shape: f32[2,8,4,16], index: 0, kind: input, shape index: {}]   ;;  %s2215_s1 = inlined_call_operand.vmem [shape: f32[16,32], index: 1, kind: input, shape index: {}]   ;;  %s2216_s2 = inlined_call_operand.vmem [shape: f32[1,32], index: 2, kind: input, shape index: {}]   ;;  %s2217_s3 = inlined_call_operand.vmem [shape: f32[8,32,128], index: 3, kind: input, shape index: {}]   ;;  %s2218_s4 = inlined_call_operand.vmem [shape: f32[1,128], index: 4, kind: input, shape index: {}]   ;;  %s2219_s5 = inlined_call_operand.vmem [shape: f32[2,4,128], index: 5, kind: output, shape index: {}]  }
   0x1   :  { %s1937_s20 = smov 0  }
   0x2 LB: > { %s27_s21 = sadd.s32 1, %s1895_s19  ;;  %p1583_p0 = scmp.ge.s32.totalorder %s1899_s20, 1  ;;  %s1899_s20 = sphi %s1937_s20, %s15_s20   ;;  %s1895_s19 = sphi %s1935_s19, %s2221_s19   ;;  %s1891_s18 = sphi %s1933_s18, %s2220_s18  }
   0x3   : > { %p29_p1 = scmp.ge.s32.totalorder %s27_s21, 2  ;;  %p206_p2 = scmp.lt.s32.totalorder %s1899_s20, 3 }
   0x5   : > { %s2223_s21 = smov (%p29_p1, %s27_s21), 0  ;;  %p207_p3 = pnand %p1583_p0, %p206_p2 }
   0x6   : > { %p239_p4 = scmp.lt.s32.totalorder (!%p207_p3), %s1891_s18, 1 }
   0x7   : > { %210 = sbr.rel (%p207_p3) target bundleno = 1016 (0x3f8), region = 40 }
   0xc   : > { %v1954_v0 = vld [vmem:[%s2215_s1 + $0x8] sm:$0xff]  ;;  %v1901_v1 = vmov 0.0   ;;  %v1960_v2 = vld [vmem:[%s2215_s1] sm:$0xff]  ;;  %vm1902_vm0 = vmmov 0   ;;  %v1594_v3 = vld [vmem:[%s2217_s3 + $0x38] sm:$0xff]  ;;  %s2225_s18 = smov (!%p239_p4, %s1891_s18), 1 }
   0xd   : > { %1707 = vmatprep.subr.mxu1 %v1901_v1  ;;  %1711 = vmatprep.mubr.msk.f32.mxu1 %vm1902_vm0, %v1901_v1  ;;  %s1642_s28 = sshll.u32 %s2225_s18, 5  ;;  %vm264_vm1 = vcmask 130048   ;;  %v341_v6 = vld [vmem:[%s2217_s3 + $0x18] sm:$0xff]  ;;  %v340_v7 = vld [vmem:[%s2217_s3 + $0x10] sm:$0xff]  ;;  %v339_v8 = vld [vmem:[%s2217_s3 + $0x8] sm:$0xff]  ;;  %vm422_vm2 = vcmask 261120  }
   0xe   : > { %1708 = vmatpush3.msra.mxu1 %v1954_v0  ;;  %1721 = vmatprep.subr.mxu0 %v1901_v1  ;;  %s1979_s6 = scalar_lea.vmem %s2214_s0, %s1642_s28  ;;  %v1593_v9 = vld [vmem:[%s2217_s3 + $0x30] sm:$0xff]  ;;  %v338_v10 = vld [vmem:[%s2217_s3] sm:$0xff]  ;;  %v1592_v11 = vld [vmem:[%s2217_s3 + $0x28] sm:$0xff]  ;;  %s1586_s10 = sshll.u32 %s2225_s18, 2 }
   0xf   : > { %1709 = vmatprep.subr.mxu1 %v1901_v1  ;;  %1722 = vmatpush3.msra.mxu0 %v1594_v3  ;;  %v254_v4 = vld [vmem:[%s1979_s6] sm:$0xf]  ;;  %v1589_v5 = vld [vmem:[%s1979_s6 + $0x4] sm:$0xf]  ;;  %v1597_v20 = vld [vmem:[%s1979_s6 + $0x8] sm:$0xf]  ;;  %s253_s15 = scalar_lea.vmem %s2219_s5, %s1586_s10 }
  0x10   : > { %1710 = vmatpush3.msra.mxu1 %v1960_v2  ;;  %1723 = vmatprep.subr.mxu0 %v1901_v1  ;;  %v1591_v12 = vld [vmem:[%s2217_s3 + $0x20] sm:$0xff]  ;;  %v1604_v21 = vld [vmem:[%s1979_s6 + $0xc] sm:$0xf]  ;;  %v1602_v22 = vld [vmem:[%s2217_s3 + $0x58] sm:$0xff] }
  0x11   : > { %1714 = vmatprep.subr.mxu1 %v1901_v1  ;;  %1729 = vmatprep.mubr.msk.f32.mxu0 %vm1902_vm0, %v1901_v1  ;;  %v2026_v13 = vld [vmem:[%s2216_s2] ss:$0 sm:$0xff]  ;;  %v1601_v23 = vld [vmem:[%s2217_s3 + $0x50] sm:$0xff]  ;;  %v1609_v24 = vld [vmem:[%s2217_s3 + $0x78] sm:$0xff] }
  0x12   : > { %1712 = vmatmul.mubr.msk.f32.vlgmr.msra.gmra.mxu1 %vm264_vm1, %v254_v4  ;;  %1724 = vmatpush3.msra.mxu0 %v1593_v9  ;;  %v1600_v25 = vld [vmem:[%s2217_s3 + $0x48] sm:$0xff]  ;;  %v1608_v26 = vld [vmem:[%s2217_s3 + $0x70] sm:$0xff]  ;;  %v1599_v27 = vld [vmem:[%s2217_s3 + $0x40] sm:$0xff] }
  0x13   : > { %1715 = vmatpush3.msra.mxu1 %v1954_v0  ;;  %1718 = vmatprep.mubr.msk.f32.mxu1 %vm1902_vm0, %v1901_v1  ;;  %v1607_v28 = vld [vmem:[%s2217_s3 + $0x68] sm:$0xff]  ;;  %v1606_v29 = vld [vmem:[%s2217_s3 + $0x60] sm:$0xff]  ;;  %v1611_v39 = vld [vmem:[%s1979_s6 + $0x10] sm:$0xf] }
  0x14   : > { %1716 = vmatprep.subr.mxu1 %v1901_v1  ;;  %1725 = vmatprep.subr.mxu0 %v1901_v1  ;;  %v1618_v42 = vld [vmem:[%s1979_s6 + $0x14] sm:$0xf]  ;;  %v1616_v43 = vld [vmem:[%s2217_s3 + $0x98] sm:$0xff]  ;;  %v1614_v46 = vld [vmem:[%s2217_s3 + $0x88] sm:$0xff] }
  0x15   : > { %1717 = vmatpush3.msra.mxu1 %v1960_v2  ;;  %1726 = vmatpush3.msra.mxu0 %v1592_v11  ;;  %v1615_v44 = vld [vmem:[%s2217_s3 + $0x90] sm:$0xff]  ;;  %v1623_v45 = vld [vmem:[%s2217_s3 + $0xb8] sm:$0xff]  ;;  %v1613_v48 = vld [vmem:[%s2217_s3 + $0x80] sm:$0xff] }
  0x16   : > { %1719 = vmatmul.mubr.msk.f32.vlgmr.msra.gmra.mxu1 %vm264_vm1, %v1589_v5  ;;  %1732 = vmatprep.subr.mxu1 %v1901_v1  ;;  %v1622_v47 = vld [vmem:[%s2217_s3 + $0xb0] sm:$0xff]  ;;  %v1621_v49 = vld [vmem:[%s2217_s3 + $0xa8] sm:$0xff]  ;;  %v1620_v50 = vld [vmem:[%s2217_s3 + $0xa0] sm:$0xff] }
  0x17   : > { %1733 = vmatpush3.msra.mxu1 %v341_v6  ;;  %1740 = vmatprep.mubr.msk.f32.mxu1 %vm1902_vm0, %v1901_v1  ;;  %v1625_v61 = vld [vmem:[%s1979_s6 + $0x18] sm:$0xf]  ;;  %v1632_v3 = vld [vmem:[%s1979_s6 + $0x1c] sm:$0xf]  ;;  %v1628_v4 = vld [vmem:[%s2217_s3 + $0xc8] sm:$0xff] }
  0x18   : > { %1734 = vmatprep.subr.mxu1 %v1901_v1  ;;  %1727 = vmatprep.subr.mxu0 %v1901_v1  ;;  %v1637_v5 = vld [vmem:[%s2217_s3 + $0xf8] sm:$0xff]  ;;  %v1627_v6 = vld [vmem:[%s2217_s3 + $0xc0] sm:$0xff] }
  0x19   : > { %1735 = vmatpush3.msra.mxu1 %v340_v7  ;;  %1728 = vmatpush3.msra.mxu0 %v1591_v12  ;;  %v1636_v7 = vld [vmem:[%s2217_s3 + $0xf0] sm:$0xff]  ;;  %v1634_v9 = vld [vmem:[%s2217_s3 + $0xe0] sm:$0xff] }
  0x1a   : > { %1736 = vmatprep.subr.mxu1 %v1901_v1  ;;  %1743 = vmatprep.subr.mxu0 %v1901_v1 }
  0x1b   : > { %1737 = vmatpush3.msra.mxu1 %v339_v8  ;;  %v1635_v8 = vld [vmem:[%s2217_s3 + $0xe8] sm:$0xff] }
  0x1c   : > { %1738 = vmatprep.subr.mxu1 %v1901_v1 }
  0x1d   : > { %1739 = vmatpush3.msra.mxu1 %v338_v10 }
  0x1e   : > { %1750 = vmatprep.subr.mxu1 %v1901_v1 }
  0xd2   : > { %v334_v14 = vpop.f32.mrf.mxu1 }
  0xd3   : > { %v335_v15 = vadd.f32 %v2026_v13, %v334_v14 }
  0xd4   : > { %v1713_v16 = vpop.f32.mrf.mxu1 }
  0xd5   : > { %1741 = vmatmul.mubr.msk.f32.vlgmr.msra.gmra.mxu1 %vm422_vm2, %v335_v15 }
  0xd6   : > { %v413_v17 = vpop.f32.mrf.mxu1  ;;  %1758 = vmatprep.mubr.msk.f32.mxu1 %vm1902_vm0, %v1901_v1  ;;  %1751 = vmatpush3.msra.mxu1 %v1602_v22 }
  0xd7   : > { %v414_v18 = vadd.f32 %v2026_v13, %v413_v17  ;;  %1752 = vmatprep.subr.mxu1 %v1901_v1 }
  0xd8   : > { %v1720_v19 = vpop.f32.mrf.mxu1  ;;  %1753 = vmatpush3.msra.mxu1 %v1601_v23 }
  0xd9   : > { %1730 = vmatmul.mubr.msk.f32.vlgmr.msra.gmra.mxu0 %vm422_vm2, %v414_v18  ;;  %1754 = vmatprep.subr.mxu1 %v1901_v1 }
  0xda   : > { %1744 = vmatpush3.msra.mxu0 %v1954_v0  ;;  %1747 = vmatprep.mubr.msk.f32.mxu0 %vm1902_vm0, %v1901_v1 }
  0xdb   : > { %1745 = vmatprep.subr.mxu0 %v1901_v1  ;;  %1755 = vmatpush3.msra.mxu1 %v1600_v25 }
  0xdc   : > { %1746 = vmatpush3.msra.mxu0 %v1960_v2  ;;  %1756 = vmatprep.subr.mxu1 %v1901_v1 }
  0xdd   : > { %1761 = vmatprep.subr.mxu0 %v1901_v1  ;;  %1748 = vmatmul.mubr.msk.f32.vlgmr.msra.gmra.mxu0 %vm264_vm1, %v1597_v20 }
  0xde   : > { %1762 = vmatpush3.msra.mxu0 %v1954_v0  ;;  %1765 = vmatprep.mubr.msk.f32.mxu0 %vm1902_vm0, %v1901_v1 }
  0xdf   : > { %1763 = vmatprep.subr.mxu0 %v1901_v1  ;;  %1757 = vmatpush3.msra.mxu1 %v1599_v27 }
  0xe0   : > { %1764 = vmatpush3.msra.mxu0 %v1960_v2  ;;  %1779 = vmatprep.subr.mxu1 %v1901_v1 }
  0xe1   : > { %1766 = vmatmul.mubr.msk.f32.vlgmr.msra.gmra.mxu0 %vm264_vm1, %v1604_v21  ;;  %1768 = vmatprep.subr.mxu0 %v1901_v1 }
  0xe2   : > { %1776 = vmatprep.mubr.msk.f32.mxu0 %vm1902_vm0, %v1901_v1  ;;  %1769 = vmatpush3.msra.mxu0 %v1609_v24 }
  0xe3   : > { %1770 = vmatprep.subr.mxu0 %v1901_v1 }
  0xe4   : > { %1771 = vmatpush3.msra.mxu0 %v1608_v26  ;;  %v1639_v26 = vld [vmem:[%s2218_s4] ss:$0 sm:$0xff] }
  0xe5   : > { %1772 = vmatprep.subr.mxu0 %v1901_v1 }
  0xe6   : > { %1773 = vmatpush3.msra.mxu0 %v1607_v28 }
  0xe7   : > { %1774 = vmatprep.subr.mxu0 %v1901_v1 }
  0xe8   : > { %1775 = vmatpush3.msra.mxu0 %v1606_v29 }
  0xe9   : > { %1797 = vmatprep.subr.mxu0 %v1901_v1 }
 0x195   : > { %v565_v30 = vpop.f32.mrf.mxu1 }
 0x197   : > { %v1742_v31 = vpop.f32.mrf.mxu1 }
 0x199   : > { %v492_v32 = vpop.f32.mrf.mxu0 }
 0x19a   : > { %v566_v33 = vadd.f32 %v565_v30, %v492_v32 }
 0x19b   : > { %v1731_v34 = vpop.f32.mrf.mxu0 }
 0x19d   : > { %v640_v35 = vpop.f32.mrf.mxu0 }
 0x19e   : > { %v641_v36 = vadd.f32 %v2026_v13, %v640_v35 }
 0x19f   : > { %v1749_v37 = vpop.f32.mrf.mxu0 }
 0x1a0   : > { %1759 = vmatmul.mubr.msk.f32.vlgmr.msra.gmra.mxu1 %vm422_vm2, %v641_v36 }
 0x1a1   : > { %v794_v38 = vpop.f32.mrf.mxu0  ;;  %1780 = vmatpush3.msra.mxu1 %v1954_v0  ;;  %1783 = vmatprep.mubr.msk.f32.mxu1 %vm1902_vm0, %v1901_v1 }
 0x1a2   : > { %v795_v40 = vadd.f32 %v2026_v13, %v794_v38  ;;  %1781 = vmatprep.subr.mxu1 %v1901_v1 }
 0x1a3   : > { %v1767_v41 = vpop.f32.mrf.mxu0  ;;  %1782 = vmatpush3.msra.mxu1 %v1960_v2 }
 0x1a4   : > { %1777 = vmatmul.mubr.msk.f32.vlgmr.msra.gmra.mxu0 %vm422_vm2, %v795_v40  ;;  %1784 = vmatmul.mubr.msk.f32.vlgmr.msra.gmra.mxu1 %vm264_vm1, %v1611_v39 }
 0x1a5   : > { %1798 = vmatpush3.msra.mxu0 %v1954_v0  ;;  %1801 = vmatprep.mubr.msk.f32.mxu0 %vm1902_vm0, %v1901_v1 }
 0x1a6   : > { %1799 = vmatprep.subr.mxu0 %v1901_v1  ;;  %1786 = vmatprep.subr.mxu1 %v1901_v1 }
 0x1a7   : > { %1800 = vmatpush3.msra.mxu0 %v1960_v2  ;;  %1794 = vmatprep.mubr.msk.f32.mxu1 %vm1902_vm0, %v1901_v1 }
 0x1a8   : > { %1802 = vmatmul.mubr.msk.f32.vlgmr.msra.gmra.mxu0 %vm264_vm1, %v1618_v42  ;;  %1804 = vmatprep.subr.mxu0 %v1901_v1 }
 0x1a9   : > { %1812 = vmatprep.mubr.msk.f32.mxu0 %vm1902_vm0, %v1901_v1  ;;  %1787 = vmatpush3.msra.mxu1 %v1616_v43 }
 0x1aa   : > { %1788 = vmatprep.subr.mxu1 %v1901_v1  ;;  %1805 = vmatpush3.msra.mxu0 %v1623_v45 }
 0x1ab   : > { %1789 = vmatpush3.msra.mxu1 %v1615_v44  ;;  %1806 = vmatprep.subr.mxu0 %v1901_v1 }
 0x1ac   : > { %1790 = vmatprep.subr.mxu1 %v1901_v1  ;;  %1807 = vmatpush3.msra.mxu0 %v1622_v47 }
 0x1ad   : > { %1791 = vmatpush3.msra.mxu1 %v1614_v46  ;;  %1808 = vmatprep.subr.mxu0 %v1901_v1 }
 0x1ae   : > { %1792 = vmatprep.subr.mxu1 %v1901_v1  ;;  %1809 = vmatpush3.msra.mxu0 %v1621_v49 }
 0x1af   : > { %1793 = vmatpush3.msra.mxu1 %v1613_v48  ;;  %1810 = vmatprep.subr.mxu0 %v1901_v1 }
 0x1b0   : > { %1815 = vmatprep.subr.mxu1 %v1901_v1  ;;  %1811 = vmatpush3.msra.mxu0 %v1620_v50 }
 0x1b1   : > { %1833 = vmatprep.subr.mxu0 %v1901_v1 }
 0x260   : > { %v718_v51 = vpop.f32.mrf.mxu1 }
 0x261   : > { %v722_v52 = vadd.f32 %v718_v51, %v566_v33 }
 0x262   : > { %v1760_v53 = vpop.f32.mrf.mxu1 }
 0x264   : > { %v872_v54 = vpop.f32.mrf.mxu0  ;;  %v948_v55 = vpop.f32.mrf.mxu1 }
 0x265   : > { %v876_v56 = vadd.f32 %v872_v54, %v722_v52  ;;  %v949_v57 = vadd.f32 %v2026_v13, %v948_v55 }
 0x266   : > { %v1778_v58 = vpop.f32.mrf.mxu0  ;;  %v1785_v59 = vpop.f32.mrf.mxu1 }
 0x267   : > { %1795 = vmatmul.mubr.msk.f32.vlgmr.msra.gmra.mxu1 %vm422_vm2, %v949_v57 }
 0x268   : > { %v1102_v60 = vpop.f32.mrf.mxu0  ;;  %1816 = vmatpush3.msra.mxu1 %v1954_v0  ;;  %1819 = vmatprep.mubr.msk.f32.mxu1 %vm1902_vm0, %v1901_v1 }
 0x269   : > { %v1103_v62 = vadd.f32 %v2026_v13, %v1102_v60  ;;  %1817 = vmatprep.subr.mxu1 %v1901_v1 }
 0x26a   : > { %v1803_v63 = vpop.f32.mrf.mxu0  ;;  %1818 = vmatpush3.msra.mxu1 %v1960_v2 }
 0x26b   : > { %1813 = vmatmul.mubr.msk.f32.vlgmr.msra.gmra.mxu0 %vm422_vm2, %v1103_v62  ;;  %1820 = vmatmul.mubr.msk.f32.vlgmr.msra.gmra.mxu1 %vm264_vm1, %v1625_v61 }
 0x26c   : > { %1834 = vmatpush3.msra.mxu0 %v1954_v0  ;;  %1837 = vmatprep.mubr.msk.f32.mxu0 %vm1902_vm0, %v1901_v1  ;;  %v1630_v0 = vld [vmem:[%s2217_s3 + $0xd8] sm:$0xff] }
 0x26d   : > { %1835 = vmatprep.subr.mxu0 %v1901_v1  ;;  %1822 = vmatprep.subr.mxu1 %v1901_v1 }
 0x26e   : > { %1836 = vmatpush3.msra.mxu0 %v1960_v2  ;;  %1830 = vmatprep.mubr.msk.f32.mxu1 %vm1902_vm0, %v1901_v1  ;;  %v1629_v2 = vld [vmem:[%s2217_s3 + $0xd0] sm:$0xff] }
 0x26f   : > { %1838 = vmatmul.mubr.msk.f32.vlgmr.msra.gmra.mxu0 %vm264_vm1, %v1632_v3  ;;  %1840 = vmatprep.subr.mxu0 %v1901_v1 }
 0x270   : > { %1848 = vmatprep.mubr.msk.f32.mxu0 %vm1902_vm0, %v1901_v1  ;;  %1823 = vmatpush3.msra.mxu1 %v1630_v0 }
 0x271   : > { %1824 = vmatprep.subr.mxu1 %v1901_v1  ;;  %1841 = vmatpush3.msra.mxu0 %v1637_v5 }
 0x272   : > { %1825 = vmatpush3.msra.mxu1 %v1629_v2  ;;  %1842 = vmatprep.subr.mxu0 %v1901_v1 }
 0x273   : > { %1826 = vmatprep.subr.mxu1 %v1901_v1  ;;  %1843 = vmatpush3.msra.mxu0 %v1636_v7 }
 0x274   : > { %1827 = vmatpush3.msra.mxu1 %v1628_v4  ;;  %1844 = vmatprep.subr.mxu0 %v1901_v1 }
 0x275   : > { %1828 = vmatprep.subr.mxu1 %v1901_v1  ;;  %1845 = vmatpush3.msra.mxu0 %v1635_v8 }
 0x276   : > { %1829 = vmatpush3.msra.mxu1 %v1627_v6  ;;  %1846 = vmatprep.subr.mxu0 %v1901_v1 }
 0x277   : > { %1847 = vmatpush3.msra.mxu0 %v1634_v9 }
 0x327   : > { %v1026_v10 = vpop.f32.mrf.mxu1 }
 0x328   : > { %v1030_v11 = vadd.f32 %v1026_v10, %v876_v56 }
 0x329   : > { %v1796_v12 = vpop.f32.mrf.mxu1 }
 0x32b   : > { %v1180_v14 = vpop.f32.mrf.mxu0  ;;  %v1256_v15 = vpop.f32.mrf.mxu1 }
 0x32c   : > { %v1184_v16 = vadd.f32 %v1180_v14, %v1030_v11  ;;  %v1257_v17 = vadd.f32 %v2026_v13, %v1256_v15 }
 0x32d   : > { %v1814_v18 = vpop.f32.mrf.mxu0  ;;  %v1821_v19 = vpop.f32.mrf.mxu1 }
 0x32e   : > { %1831 = vmatmul.mubr.msk.f32.vlgmr.msra.gmra.mxu1 %vm422_vm2, %v1257_v17 }
 0x32f   : > { %v1410_v20 = vpop.f32.mrf.mxu0 }
 0x330   : > { %v1411_v1 = vadd.f32 %v2026_v13, %v1410_v20 }
 0x331   : > { %v1839_v21 = vpop.f32.mrf.mxu0 }
 0x332   : > { %1849 = vmatmul.mubr.msk.f32.vlgmr.msra.gmra.mxu0 %vm422_vm2, %v1411_v1 }
 0x3ee   : > { %v1334_v22 = vpop.f32.mrf.mxu1 }
 0x3ef   : > { %v1338_v24 = vadd.f32 %v1334_v22, %v1184_v16 }
 0x3f0   : > { %v1832_v23 = vpop.f32.mrf.mxu1 }
 0x3f2   : > { %v1488_v25 = vpop.f32.mrf.mxu0 }
 0x3f3   : > { %v1492_v27 = vadd.f32 %v1488_v25, %v1338_v24 }
 0x3f4   : > { %v1850_v28 = vpop.f32.mrf.mxu0 }
 0x3f5   : > { %v1500_v29 = vadd.f32 %v1639_v26, %v1492_v27 }
 0x3f7   : > { %1501 = vst [vmem:[%s253_s15] sm:$0xf] %v1500_v29 }
 0x3f8 PF: > { %s15_s20 = sadd.s32 1, %s1899_s20   ;;  %s2220_s18 = smov %s1895_s19 }
 0x3f9   : > { %p12_p5 = scmp.ge.s32.totalorder %s15_s20, 4   ;;  %s2221_s19 = smov %s2223_s21 }
 0x3fb   :  { %14 = sbr.rel (!%p12_p5) target bundleno = 2 (0x2), region = 84 }

</bundles_post_ra>
